<compile_context>
chip_gen: v7x
topology: tpu7x:2x2x1
jax: 0.10.0
libtpu: 0.0.40
codegen_flags: <defaults>
</compile_context>

<pallas_src>
import functools

import jax
import jax.numpy as jnp
from jax.experimental import pallas as pl
from jax.experimental.pallas import tpu as pltpu


# --------------------------------------------------------------------------- #
# Kernel
# --------------------------------------------------------------------------- #
def _filtfilt_kernel(fir_ref, x_ref, o_ref, xp_ref, *,
                     fir_len, sig_len, lane_pad, use_xlu_roll):
    """fir_ref: SMEM (F,) f32 = flip(fir_coeff) (the torch parameter).
    x_ref/o_ref: VMEM (row_tile, L) blocks of the unpadded signal/output.
    xp_ref: VMEM (row_tile, L_pad) scratch; L_pad is a multiple of 128 with
    L_pad - L >= F - 1, so every circular lane-roll wraps into zero lanes."""
    F = fir_len
    L = sig_len
    Lp = lane_pad
    lp = F // 2
    R = xp_ref.shape[0]

    # Assemble the lane-padded signal [x | zeros] in VMEM (no HBM pad pass).
    if L < Lp:
        xp_ref[:, L:Lp] = jnp.zeros((R, Lp - L), dtype=jnp.float32)
    xp_ref[:, 0:L] = x_ref[...].astype(jnp.float32)
    x = xp_ref[...]

    def shift_lanes(v, s):
        s = s % Lp                        # static Python int, non-negative
        if s == 0:
            return v
        if use_xlu_roll:
            return pltpu.roll(v, s, 1)    # XLU lane rotation (axis must be >= 0)
        return jnp.roll(v, s, axis=1)     # fallback: same circular semantics

    def correlate(v, sign):
        # sign=+1: acc[n] = sum_k w[k] * v[n + k - lp]   (forward pass)
        # sign=-1: acc[n] = sum_k w[k] * v[n - k + lp]   (backward pass; the
        #          reference's two flips folded in algebraically)
        # Out-of-range accesses wrap circularly into lanes that are zero by
        # construction, matching the reference's zero padding for all n < L.
        acc = fir_ref[0] * shift_lanes(v, sign * lp)
        for k in range(1, F):             # F is small & static -> unrolled
            acc = acc + fir_ref[k] * shift_lanes(v, sign * (lp - k))
        return acc

    fwd = correlate(x, +1)
    if L < Lp:
        # The reference truncates the forward result to length L before the
        # second pass; zero the pad lanes with one broadcast multiply.
        lane = jax.lax.broadcasted_iota(jnp.int32, (1, Lp), 1)
        fwd = fwd * (lane < L).astype(jnp.float32)
    out = correlate(fwd, -1)

    # Unpadded, masked trailing store (cheaper than a wrapper-side HBM slice).
    o_ref[...] = out[:, 0:L].astype(o_ref.dtype)


# --------------------------------------------------------------------------- #
# Planning / capability probing
# --------------------------------------------------------------------------- #
_XLU_ROLL_OK = None


def _xlu_roll_supported():
    """One-time probe: can this runtime lower/execute pltpu.roll?  Real Mosaic
    TPU compiles can; if the environment cannot, fall back to jnp.roll."""
    global _XLU_ROLL_OK
    if _XLU_ROLL_OK is None:
        def probe(x_ref, o_ref):
            o_ref[...] = pltpu.roll(x_ref[...], 1, 1)
        try:
            z = jnp.zeros((8, 128), jnp.float32)
            jax.block_until_ready(
                pl.pallas_call(
                    probe,
                    out_shape=jax.ShapeDtypeStruct((8, 128), jnp.float32),
                )(z))
            _XLU_ROLL_OK = True
        except Exception:
            _XLU_ROLL_OK = False
    return _XLU_ROLL_OK


def _plan(rows, sig_len, fir_len):
    """Pick lane padding, row tile and VMEM limit per chip generation."""
    l_pad = ((sig_len + max(fir_len - 1, 0) + 127) // 128) * 128
    try:
        vmem_cap = int(pltpu.get_tpu_info().vmem_capacity_bytes)
    except Exception:
        vmem_cap = 128 * 1024 * 1024
    small_vmem = vmem_cap <= 96 * 1024 * 1024      # v7x-like: 64 MiB / TensorCore
    tile_budget = (3 if small_vmem else 8) * 1024 * 1024
    min_steps = 4 if small_vmem else 1             # >=2 steps per TC on 2-TC parts

    row_bytes = l_pad * 4
    cap = (tile_budget // row_bytes) // 8 * 8
    cap = max(8, min(4096, cap))                   # byte-capped, not row-capped

    if rows <= 8:
        row_tile = rows                            # block dim == full dim: legal
    else:
        row_tile = min(cap, (rows // 8) * 8)
        if min_steps > 1:
            per_step = max(8, (rows // min_steps) // 8 * 8)
            row_tile = min(row_tile, per_step)

    # VMEM accounting: double-buffered in/out DMA windows + padded scratch +
    # ~6 live tile-sized value temporaries, with 1.5x headroom.
    io_bytes = row_tile * sig_len * 4
    tile_bytes = row_tile * l_pad * 4
    need = 4 * io_bytes + 7 * tile_bytes
    ceil_bytes = (40 if small_vmem else 64) * 1024 * 1024
    vmem_limit = int(min(ceil_bytes, max(8 * 1024 * 1024, need * 3 // 2)))
    return l_pad, row_tile, vmem_limit


# --------------------------------------------------------------------------- #
# Wrapper
# --------------------------------------------------------------------------- #
def firfiltfilt(x, fir_flipped, *, row_tile=None):
    """x: (B, C, L) float32 (torch NCL layout).
    fir_flipped: (F,) float32 == flip(fir_coeff), i.e. the torch nn.Parameter."""
    B, C, L = x.shape
    F = int(fir_flipped.shape[0])
    rows = B * C

    x2 = x.reshape(rows, L)                         # metadata-only reshape
    if x2.dtype != jnp.float32:
        x2 = x2.astype(jnp.float32)

    l_pad, auto_tile, vmem_limit = _plan(rows, L, F)
    if row_tile is None:
        row_tile = auto_tile
    row_tile = min(int(row_tile), rows)

    kernel = functools.partial(
        _filtfilt_kernel, fir_len=F, sig_len=L, lane_pad=l_pad,
        use_xlu_roll=_xlu_roll_supported())

    cost = pl.CostEstimate(
        flops=4 * F * rows * l_pad,                 # 2 passes x (mul+add) / tap
        transcendentals=0,
        bytes_accessed=2 * rows * L * 4 + F * 4)

    # TODO(synk): for very long signals (L >~ 1e5) additionally block the time
    # axis in the grid with an F-1 halo (manual make_async_copy windows), and
    # for long filters (F >~ 16 on v6e/v7x) switch the tap loop to an MXU
    # banded-Toeplitz matmul per 128-lane block.
    out = pl.pallas_call(
        kernel,
        out_shape=jax.ShapeDtypeStruct((rows, L), jnp.float32),
        grid=(pl.cdiv(rows, row_tile),),
        in_specs=[
            pl.BlockSpec(memory_space=pltpu.MemorySpace.SMEM),    # FIR taps
            pl.BlockSpec((row_tile, L), lambda i: (i, 0)),        # signal rows
        ],
        out_specs=pl.BlockSpec((row_tile, L), lambda i: (i, 0)),
        scratch_shapes=[pltpu.VMEM((row_tile, l_pad), jnp.float32)],
        compiler_params=pltpu.CompilerParams(
            dimension_semantics=("parallel",),
            vmem_limit_bytes=vmem_limit,
        ),
        cost_estimate=cost,
    )(fir_flipped.astype(jnp.float32), x2)

    return out.reshape(B, C, L)


# --------------------------------------------------------------------------- #
# Pure-JAX reference (mirrors the torch filtfilt_v2 forward) + demo
# --------------------------------------------------------------------------- #
def _reference_filtfilt(x, fir_flipped):
    F = fir_flipped.shape[0]
    lp, rp = F // 2, F - 1 - F // 2
    L = x.shape[-1]

    def corr(s):  # torch conv1d == cross-correlation with the stored taps
        sp = jnp.pad(s, ((0, 0), (0, 0), (lp, rp)))
        return sum(fir_flipped[k] * sp[..., k:k + L] for k in range(F))

    fwd = corr(x)[..., ::-1]
    return corr(fwd)[..., ::-1]


if __name__ == "__main__":
    key = jax.random.PRNGKey(0)

    # --- test 1: odd filter length, single-block row grid -------------------
    F = 9
    fir_coeff = (jnp.arange(1, F + 1, dtype=jnp.float32)
                 / jnp.sum(jnp.arange(1, F + 1, dtype=jnp.float32)))
    fir_flipped = fir_coeff[::-1]                   # == the torch nn.Parameter

    B, C, L = 2, 4, 64
    x = jax.random.normal(key, (B, C, L), dtype=jnp.float32)

    y = jax.block_until_ready(firfiltfilt(x, fir_flipped))
    y_ref = _reference_filtfilt(x, fir_flipped)
    assert y.shape == (B, C, L)
    assert jnp.allclose(y, y_ref, atol=1e-5, rtol=1e-5), "test1 mismatch"

    # --- test 2: even filter length, multi-step grid with a partial last row
    #             block (rows=15, row_tile=8) and non-128-aligned L ----------
    F2 = 8
    k1, k2 = jax.random.split(key)
    fir2 = jax.random.normal(k1, (F2,), dtype=jnp.float32)
    fir2 = fir2 / jnp.sum(jnp.abs(fir2))
    fir2_flipped = fir2[::-1]
    B2, C2, L2 = 3, 5, 200
    x_big = jax.random.normal(k2, (B2, C2, L2), dtype=jnp.float32)

    y2 = jax.block_until_ready(firfiltfilt(x_big, fir2_flipped, row_tile=8))
    y2_ref = _reference_filtfilt(x_big, fir2_flipped)
    assert y2.shape == (B2, C2, L2)
    assert jnp.allclose(y2, y2_ref, atol=1e-4, rtol=1e-4), "test2 mismatch"

    print("KERNEL_OK")
</pallas_src>

<mosaic_0001>
module attributes {stable_mosaic.version = 11 : i64} {
  func.func @probe(%arg0: memref<8x128xf32, #tpu.memory_space<vmem>>, %arg1: memref<8x128xf32, #tpu.memory_space<vmem>>) attributes {dimension_semantics = [], scalar_prefetch = 0 : i64, scratch_operands = 0 : i64, tpu.core_type = #tpu.core_type<tc>} {
    %c0 = arith.constant 0 : index
    %c0_0 = arith.constant 0 : index
    %0 = vector.load %arg0[%c0, %c0_0] : memref<8x128xf32, #tpu.memory_space<vmem>>, vector<8x128xf32>
    %c1_i32 = arith.constant 1 : i32
    %1 = tpu.dynamic_rotate %0 by %c1_i32 dim 1 : vector<8x128xf32>, i32 -> vector<8x128xf32>
    %c0_1 = arith.constant 0 : index
    %c0_2 = arith.constant 0 : index
    %2 = vector.load %arg1[%c0_1, %c0_2] : memref<8x128xf32, #tpu.memory_space<vmem>>, vector<8x128xf32>
    tpu.vector_store %arg1[%c0_1, %c0_2], %1 {strides = array<i32>} : memref<8x128xf32, #tpu.memory_space<vmem>>, vector<8x128xf32>,
    return
  }
}

module attributes {stable_mosaic.version = 11 : i64} {
  func.func @_filtfilt_kernel(%arg0: i32, %arg1: memref<9xf32, #tpu.memory_space<smem>>, %arg2: memref<8x64xf32, #tpu.memory_space<vmem>>, %arg3: memref<8x64xf32, #tpu.memory_space<vmem>>, %arg4: memref<8x128xf32, #tpu.memory_space<vmem>>) attributes {dimension_semantics = [#tpu.dimension_semantics<parallel>], iteration_bounds = array<i64: 1>, scalar_prefetch = 0 : i64, scratch_operands = 1 : i64, tpu.core_type = #tpu.core_type<tc>, window_params = [{transform_indices = @transform_0, window_bounds = array<i64: 9>}, {transform_indices = @transform_1, window_bounds = array<i64: 8, 64>}, {transform_indices = @transform_2, window_bounds = array<i64: 8, 64>}]} {
    %cst = arith.constant 0.000000e+00 : f32
    %0 = vector.broadcast %cst : f32 to vector<8x64xf32>
    %c0 = arith.constant 0 : index
    %c64 = arith.constant 64 : index
    %1 = vector.load %arg4[%c0, %c64] : memref<8x128xf32, #tpu.memory_space<vmem>>, vector<8x64xf32>
    tpu.vector_store %arg4[%c0, %c64], %0 {strides = array<i32>} : memref<8x128xf32, #tpu.memory_space<vmem>>, vector<8x64xf32>,
    %c0_0 = arith.constant 0 : index
    %c0_1 = arith.constant 0 : index
    %2 = vector.load %arg2[%c0_0, %c0_1] : memref<8x64xf32, #tpu.memory_space<vmem>>, vector<8x64xf32>
    %c0_2 = arith.constant 0 : index
    %c0_3 = arith.constant 0 : index
    %3 = vector.load %arg4[%c0_2, %c0_3] : memref<8x128xf32, #tpu.memory_space<vmem>>, vector<8x64xf32>
    tpu.vector_store %arg4[%c0_2, %c0_3], %2 {strides = array<i32>} : memref<8x128xf32, #tpu.memory_space<vmem>>, vector<8x64xf32>,
    %c0_4 = arith.constant 0 : index
    %c0_5 = arith.constant 0 : index
    %4 = vector.load %arg4[%c0_4, %c0_5] : memref<8x128xf32, #tpu.memory_space<vmem>>, vector<8x128xf32>
    %c0_6 = arith.constant 0 : index
    %5 = memref.load %arg1[%c0_6] : memref<9xf32, #tpu.memory_space<smem>>
    %6 = vector.extract_strided_slice %4 {offsets = [0, 124], sizes = [8, 4], strides = [1, 1]} : vector<8x128xf32> to vector<8x4xf32>
    %7 = vector.extract_strided_slice %4 {offsets = [0, 0], sizes = [8, 124], strides = [1, 1]} : vector<8x128xf32> to vector<8x124xf32>
    %8 = tpu.concatenate %6, %7 in 1 : vector<8x4xf32>, vector<8x124xf32> -> vector<8x128xf32>
    %9 = vector.broadcast %5 : f32 to vector<8x128xf32>
    %10 = arith.mulf %9, %8 : vector<8x128xf32>
    %c1 = arith.constant 1 : index
    %11 = memref.load %arg1[%c1] : memref<9xf32, #tpu.memory_space<smem>>
    %12 = vector.extract_strided_slice %4 {offsets = [0, 125], sizes = [8, 3], strides = [1, 1]} : vector<8x128xf32> to vector<8x3xf32>
    %13 = vector.extract_strided_slice %4 {offsets = [0, 0], sizes = [8, 125], strides = [1, 1]} : vector<8x128xf32> to vector<8x125xf32>
    %14 = tpu.concatenate %12, %13 in 1 : vector<8x3xf32>, vector<8x125xf32> -> vector<8x128xf32>
    %15 = vector.broadcast %11 : f32 to vector<8x128xf32>
    %16 = arith.mulf %15, %14 : vector<8x128xf32>
    %17 = arith.addf %10, %16 : vector<8x128xf32>
    %c2 = arith.constant 2 : index
    %18 = memref.load %arg1[%c2] : memref<9xf32, #tpu.memory_space<smem>>
    %19 = vector.extract_strided_slice %4 {offsets = [0, 126], sizes = [8, 2], strides = [1, 1]} : vector<8x128xf32> to vector<8x2xf32>
    %20 = vector.extract_strided_slice %4 {offsets = [0, 0], sizes = [8, 126], strides = [1, 1]} : vector<8x128xf32> to vector<8x126xf32>
    %21 = tpu.concatenate %19, %20 in 1 : vector<8x2xf32>, vector<8x126xf32> -> vector<8x128xf32>
    %22 = vector.broadcast %18 : f32 to vector<8x128xf32>
    %23 = arith.mulf %22, %21 : vector<8x128xf32>
    %24 = arith.addf %17, %23 : vector<8x128xf32>
    %c3 = arith.constant 3 : index
    %25 = memref.load %arg1[%c3] : memref<9xf32, #tpu.memory_space<smem>>
    %26 = vector.extract_strided_slice %4 {offsets = [0, 127], sizes = [8, 1], strides = [1, 1]} : vector<8x128xf32> to vector<8x1xf32>
    %27 = vector.extract_strided_slice %4 {offsets = [0, 0], sizes = [8, 127], strides = [1, 1]} : vector<8x128xf32> to vector<8x127xf32>
    %28 = tpu.concatenate %26, %27 in 1 : vector<8x1xf32>, vector<8x127xf32> -> vector<8x128xf32>
    %29 = vector.broadcast %25 : f32 to vector<8x128xf32>
    %30 = arith.mulf %29, %28 : vector<8x128xf32>
    %31 = arith.addf %24, %30 : vector<8x128xf32>
    %c4 = arith.constant 4 : index
    %32 = memref.load %arg1[%c4] : memref<9xf32, #tpu.memory_space<smem>>
    %33 = vector.broadcast %32 : f32 to vector<8x128xf32>
    %34 = arith.mulf %33, %4 : vector<8x128xf32>
    %35 = arith.addf %31, %34 : vector<8x128xf32>
    %c5 = arith.constant 5 : index
    %36 = memref.load %arg1[%c5] : memref<9xf32, #tpu.memory_space<smem>>
    %37 = vector.extract_strided_slice %4 {offsets = [0, 1], sizes = [8, 127], strides = [1, 1]} : vector<8x128xf32> to vector<8x127xf32>
    %38 = vector.extract_strided_slice %4 {offsets = [0, 0], sizes = [8, 1], strides = [1, 1]} : vector<8x128xf32> to vector<8x1xf32>
    %39 = tpu.concatenate %37, %38 in 1 : vector<8x127xf32>, vector<8x1xf32> -> vector<8x128xf32>
    %40 = vector.broadcast %36 : f32 to vector<8x128xf32>
    %41 = arith.mulf %40, %39 : vector<8x128xf32>
    %42 = arith.addf %35, %41 : vector<8x128xf32>
    %c6 = arith.constant 6 : index
    %43 = memref.load %arg1[%c6] : memref<9xf32, #tpu.memory_space<smem>>
    %44 = vector.extract_strided_slice %4 {offsets = [0, 2], sizes = [8, 126], strides = [1, 1]} : vector<8x128xf32> to vector<8x126xf32>
    %45 = vector.extract_strided_slice %4 {offsets = [0, 0], sizes = [8, 2], strides = [1, 1]} : vector<8x128xf32> to vector<8x2xf32>
    %46 = tpu.concatenate %44, %45 in 1 : vector<8x126xf32>, vector<8x2xf32> -> vector<8x128xf32>
    %47 = vector.broadcast %43 : f32 to vector<8x128xf32>
    %48 = arith.mulf %47, %46 : vector<8x128xf32>
    %49 = arith.addf %42, %48 : vector<8x128xf32>
    %c7 = arith.constant 7 : index
    %50 = memref.load %arg1[%c7] : memref<9xf32, #tpu.memory_space<smem>>
    %51 = vector.extract_strided_slice %4 {offsets = [0, 3], sizes = [8, 125], strides = [1, 1]} : vector<8x128xf32> to vector<8x125xf32>
    %52 = vector.extract_strided_slice %4 {offsets = [0, 0], sizes = [8, 3], strides = [1, 1]} : vector<8x128xf32> to vector<8x3xf32>
    %53 = tpu.concatenate %51, %52 in 1 : vector<8x125xf32>, vector<8x3xf32> -> vector<8x128xf32>
    %54 = vector.broadcast %50 : f32 to vector<8x128xf32>
    %55 = arith.mulf %54, %53 : vector<8x128xf32>
    %56 = arith.addf %49, %55 : vector<8x128xf32>
    %c8 = arith.constant 8 : index
    %57 = memref.load %arg1[%c8] : memref<9xf32, #tpu.memory_space<smem>>
    %58 = vector.extract_strided_slice %4 {offsets = [0, 4], sizes = [8, 124], strides = [1, 1]} : vector<8x128xf32> to vector<8x124xf32>
    %59 = vector.extract_strided_slice %4 {offsets = [0, 0], sizes = [8, 4], strides = [1, 1]} : vector<8x128xf32> to vector<8x4xf32>
    %60 = tpu.concatenate %58, %59 in 1 : vector<8x124xf32>, vector<8x4xf32> -> vector<8x128xf32>
    %61 = vector.broadcast %57 : f32 to vector<8x128xf32>
    %62 = arith.mulf %61, %60 : vector<8x128xf32>
    %63 = arith.addf %56, %62 : vector<8x128xf32>
    %64 = tpu.iota {dimensions = array<i32: 1>} : vector<1x128xi32>
    %c64_i32 = arith.constant 64 : i32
    %65 = vector.broadcast %c64_i32 : i32 to vector<1x128xi32>
    %66 = arith.cmpi slt, %64, %65 : vector<1x128xi32>
    %67 = arith.extui %66 : vector<1x128xi1> to vector<1x128xi32>
    %68 = arith.sitofp %67 : vector<1x128xi32> to vector<1x128xf32>
    %69 = vector.broadcast %68 : vector<1x128xf32> to vector<8x128xf32>
    %70 = arith.mulf %63, %69 : vector<8x128xf32>
    %c0_7 = arith.constant 0 : index
    %71 = memref.load %arg1[%c0_7] : memref<9xf32, #tpu.memory_space<smem>>
    %72 = vector.extract_strided_slice %70 {offsets = [0, 4], sizes = [8, 124], strides = [1, 1]} : vector<8x128xf32> to vector<8x124xf32>
    %73 = vector.extract_strided_slice %70 {offsets = [0, 0], sizes = [8, 4], strides = [1, 1]} : vector<8x128xf32> to vector<8x4xf32>
    %74 = tpu.concatenate %72, %73 in 1 : vector<8x124xf32>, vector<8x4xf32> -> vector<8x128xf32>
    %75 = vector.broadcast %71 : f32 to vector<8x128xf32>
    %76 = arith.mulf %75, %74 : vector<8x128xf32>
    %c1_8 = arith.constant 1 : index
    %77 = memref.load %arg1[%c1_8] : memref<9xf32, #tpu.memory_space<smem>>
    %78 = vector.extract_strided_slice %70 {offsets = [0, 3], sizes = [8, 125], strides = [1, 1]} : vector<8x128xf32> to vector<8x125xf32>
    %79 = vector.extract_strided_slice %70 {offsets = [0, 0], sizes = [8, 3], strides = [1, 1]} : vector<8x128xf32> to vector<8x3xf32>
    %80 = tpu.concatenate %78, %79 in 1 : vector<8x125xf32>, vector<8x3xf32> -> vector<8x128xf32>
    %81 = vector.broadcast %77 : f32 to vector<8x128xf32>
    %82 = arith.mulf %81, %80 : vector<8x128xf32>
    %83 = arith.addf %76, %82 : vector<8x128xf32>
    %c2_9 = arith.constant 2 : index
    %84 = memref.load %arg1[%c2_9] : memref<9xf32, #tpu.memory_space<smem>>
    %85 = vector.extract_strided_slice %70 {offsets = [0, 2], sizes = [8, 126], strides = [1, 1]} : vector<8x128xf32> to vector<8x126xf32>
    %86 = vector.extract_strided_slice %70 {offsets = [0, 0], sizes = [8, 2], strides = [1, 1]} : vector<8x128xf32> to vector<8x2xf32>
    %87 = tpu.concatenate %85, %86 in 1 : vector<8x126xf32>, vector<8x2xf32> -> vector<8x128xf32>
    %88 = vector.broadcast %84 : f32 to vector<8x128xf32>
    %89 = arith.mulf %88, %87 : vector<8x128xf32>
    %90 = arith.addf %83, %89 : vector<8x128xf32>
    %c3_10 = arith.constant 3 : index
    %91 = memref.load %arg1[%c3_10] : memref<9xf32, #tpu.memory_space<smem>>
    %92 = vector.extract_strided_slice %70 {offsets = [0, 1], sizes = [8, 127], strides = [1, 1]} : vector<8x128xf32> to vector<8x127xf32>
    %93 = vector.extract_strided_slice %70 {offsets = [0, 0], sizes = [8, 1], strides = [1, 1]} : vector<8x128xf32> to vector<8x1xf32>
    %94 = tpu.concatenate %92, %93 in 1 : vector<8x127xf32>, vector<8x1xf32> -> vector<8x128xf32>
    %95 = vector.broadcast %91 : f32 to vector<8x128xf32>
    %96 = arith.mulf %95, %94 : vector<8x128xf32>
    %97 = arith.addf %90, %96 : vector<8x128xf32>
    %c4_11 = arith.constant 4 : index
    %98 = memref.load %arg1[%c4_11] : memref<9xf32, #tpu.memory_space<smem>>
    %99 = vector.broadcast %98 : f32 to vector<8x128xf32>
    %100 = arith.mulf %99, %70 : vector<8x128xf32>
    %101 = arith.addf %97, %100 : vector<8x128xf32>
    %c5_12 = arith.constant 5 : index
    %102 = memref.load %arg1[%c5_12] : memref<9xf32, #tpu.memory_space<smem>>
    %103 = vector.extract_strided_slice %70 {offsets = [0, 127], sizes = [8, 1], strides = [1, 1]} : vector<8x128xf32> to vector<8x1xf32>
    %104 = vector.extract_strided_slice %70 {offsets = [0, 0], sizes = [8, 127], strides = [1, 1]} : vector<8x128xf32> to vector<8x127xf32>
    %105 = tpu.concatenate %103, %104 in 1 : vector<8x1xf32>, vector<8x127xf32> -> vector<8x128xf32>
    %106 = vector.broadcast %102 : f32 to vector<8x128xf32>
    %107 = arith.mulf %106, %105 : vector<8x128xf32>
    %108 = arith.addf %101, %107 : vector<8x128xf32>
    %c6_13 = arith.constant 6 : index
    %109 = memref.load %arg1[%c6_13] : memref<9xf32, #tpu.memory_space<smem>>
    %110 = vector.extract_strided_slice %70 {offsets = [0, 126], sizes = [8, 2], strides = [1, 1]} : vector<8x128xf32> to vector<8x2xf32>
    %111 = vector.extract_strided_slice %70 {offsets = [0, 0], sizes = [8, 126], strides = [1, 1]} : vector<8x128xf32> to vector<8x126xf32>
    %112 = tpu.concatenate %110, %111 in 1 : vector<8x2xf32>, vector<8x126xf32> -> vector<8x128xf32>
    %113 = vector.broadcast %109 : f32 to vector<8x128xf32>
    %114 = arith.mulf %113, %112 : vector<8x128xf32>
    %115 = arith.addf %108, %114 : vector<8x128xf32>
    %c7_14 = arith.constant 7 : index
    %116 = memref.load %arg1[%c7_14] : memref<9xf32, #tpu.memory_space<smem>>
    %117 = vector.extract_strided_slice %70 {offsets = [0, 125], sizes = [8, 3], strides = [1, 1]} : vector<8x128xf32> to vector<8x3xf32>
    %118 = vector.extract_strided_slice %70 {offsets = [0, 0], sizes = [8, 125], strides = [1, 1]} : vector<8x128xf32> to vector<8x125xf32>
    %119 = tpu.concatenate %117, %118 in 1 : vector<8x3xf32>, vector<8x125xf32> -> vector<8x128xf32>
    %120 = vector.broadcast %116 : f32 to vector<8x128xf32>
    %121 = arith.mulf %120, %119 : vector<8x128xf32>
    %122 = arith.addf %115, %121 : vector<8x128xf32>
    %c8_15 = arith.constant 8 : index
    %123 = memref.load %arg1[%c8_15] : memref<9xf32, #tpu.memory_space<smem>>
    %124 = vector.extract_strided_slice %70 {offsets = [0, 124], sizes = [8, 4], strides = [1, 1]} : vector<8x128xf32> to vector<8x4xf32>
    %125 = vector.extract_strided_slice %70 {offsets = [0, 0], sizes = [8, 124], strides = [1, 1]} : vector<8x128xf32> to vector<8x124xf32>
    %126 = tpu.concatenate %124, %125 in 1 : vector<8x4xf32>, vector<8x124xf32> -> vector<8x128xf32>
    %127 = vector.broadcast %123 : f32 to vector<8x128xf32>
    %128 = arith.mulf %127, %126 : vector<8x128xf32>
    %129 = arith.addf %122, %128 : vector<8x128xf32>
    %130 = vector.extract_strided_slice %129 {offsets = [0, 0], sizes = [8, 64], strides = [1, 1]} : vector<8x128xf32> to vector<8x64xf32>
    %c0_16 = arith.constant 0 : index
    %c0_17 = arith.constant 0 : index
    %131 = vector.load %arg3[%c0_16, %c0_17] : memref<8x64xf32, #tpu.memory_space<vmem>>, vector<8x64xf32>
    tpu.vector_store %arg3[%c0_16, %c0_17], %130 {strides = array<i32>} : memref<8x64xf32, #tpu.memory_space<vmem>>, vector<8x64xf32>,
    return
  }
  func.func @transform_0(%arg0: i32) -> i32 {
    %c0_i32 = arith.constant 0 : i32
    %c0_i32_0 = arith.constant 0 : i32
    return %c0_i32 : i32
  }
  func.func @transform_1(%arg0: i32) -> (i32, i32) {
    %c0_i32 = arith.constant 0 : i32
    %c0_i32_0 = arith.constant 0 : i32
    return %arg0, %c0_i32 : i32, i32
  }
  func.func @transform_2(%arg0: i32) -> (i32, i32) {
    %c0_i32 = arith.constant 0 : i32
    %c0_i32_0 = arith.constant 0 : i32
    return %arg0, %c0_i32 : i32, i32
  }
}

</mosaic_0001>

<bundles_post_ra>
// kernel: tpu_custom_call.1
= control target key start
LH: loop header
LB: loop body
LE: loop exit
PB: predicated region body
PF: predicated region fallthrough
CT: control target
= control target key end

     0   :  { %6 = vsyncpa [#allocation3], 0  ;;  %s128_s0 = inlined_call_operand.hbm [shape: f32[8,128], index: 0, kind: input, shape index: {}]   ;;  %s129_s1 = inlined_call_operand.hbm [shape: f32[8,128], index: 1, kind: output, shape index: {}]  }
   0x1   :  { %7 = vsyncpa [#allocation4], 0  ;;  %s91_s6 = smov [#allocation2]   ;;  %s43_s10 = scalar_lea.hbm %s128_s0, 128 }
   0x2   :  { %s14_s7 = sshll.u32 %s91_s6, 4  ;;  %p44_p0 = scmp.ne.s32.totalorder %s128_s0, %s43_s10  ;;  %s15_s7 = int_to_ptr.vmem [resolvable:$true] %s14_s7 }
   0x3   :  { %p47_p1 = scmp.lt.u32.totalorder %s43_s10, %s128_s0 }
   0x5   :  { %p49_p2 = pnand %p47_p1, %p44_p0 }
   0x7   :  { %52 = shalt.err (!%p49_p2)
}
   0x8   :  { %s53_s15 = scalar_lea.vmem %s15_s7, 128  ;;  %p58_p4 = scmp.lt.s32.totalorder %s15_s7, %s15_s7 }
   0x9   :  { %p54_p3 = scmp.ne.s32.totalorder %s15_s7, %s53_s15  ;;  %p59_p5 = scmp.lt.s32.totalorder %s53_s15, %s53_s15 }
   0xb   :  { %p60_p6 = por %p59_p5, %p58_p4 }
   0xd   :  { %p61_p7 = pnand %p60_p6, %p54_p3 }
   0xf   :  { %64 = shalt.err (!%p61_p7)
}
  0x10   :  { %17 = dma.hbm_to_vmem [thread:$0]  %s128_s0, 128, %s15_s7, [#allocation3]  }
  0x11   :  { %87 = dma.done.wait [#allocation3], 128  }
  0x12   :  { %88 = vsyncadd [#allocation3], 4294967168  ;;  %v21_v0 = vld [vmem:[#allocation2] sm:$0xff]  ;;  %s92_s18 = smov 1   ;;  %s93_s19 = smov [#allocation5]  }
  0x13   :  { %22 = vrot.lane.b32.xlu0 %v21_v0, %s92_s18  ;;  %s31_s20 = sshll.u32 %s93_s19, 4  ;;  %s32_s20 = int_to_ptr.vmem [resolvable:$true] %s31_s20 }
  0x14   :  { %s65_s21 = scalar_lea.vmem %s32_s20, 128  ;;  %p70_p9 = scmp.lt.s32.totalorder %s32_s20, %s32_s20 }
  0x15   :  { %p66_p8 = scmp.ne.s32.totalorder %s32_s20, %s65_s21  ;;  %p71_p10 = scmp.lt.s32.totalorder %s65_s21, %s65_s21 }
  0x17   :  { %p72_p11 = por %p71_p10, %p70_p9 }
  0x19   :  { %p73_p12 = pnand %p72_p11, %p66_p8 }
  0x85   :  { %v23_v1 = vpop.permute.xlu0 %22 }
  0x86   :  { %24 = vst [vmem:[#allocation5] sm:$0xff] %v23_v1 }
  0x87   :  { %76 = shalt.err (!%p73_p12)
}
  0x88   :  { %s77_s0 = scalar_lea.hbm %s129_s1, 128 }
  0x89   :  { %p78_p13 = scmp.ne.s32.totalorder %s129_s1, %s77_s0  ;;  %p81_p0 = scmp.lt.u32.totalorder %s77_s0, %s129_s1 }
  0x8b   :  { %p83_p1 = pnand %p81_p0, %p78_p13 }
  0x8d   :  { %86 = shalt.err (!%p83_p1)
}
  0x8e   :  { %34 = dma.vmem_to_hbm [thread:$0]  %s32_s20, 128, %s129_s1, [#allocation4]  }
  0x8f   :  { %89 = dma.done.wait [#allocation4], 128  }
  0x90   :  { %90 = vsyncadd [#allocation4], 4294967168 }
  0x91   :  { %38 = vsyncpa [#allocation3], 1 }
  0x92   :  { %39 = vsyncpa [#allocation4], 1 }

// kernel: tpu_custom_call.1
= control target key start
LH: loop header
LB: loop body
LE: loop exit
PB: predicated region body
PF: predicated region fallthrough
CT: control target
= control target key end

     0   :  { %7 = vsyncpa [#allocation6], 0  ;;  %s357_s0 = inlined_call_operand.hbm [shape: f32[9], index: 0, kind: input, shape index: {}]   ;;  %s358_s1 = inlined_call_operand.hbm [shape: f32[8,64], index: 1, kind: input, shape index: {}]   ;;  %s359_s2 = inlined_call_operand.hbm [shape: f32[8,64], index: 2, kind: output, shape index: {}]  }
   0x1   :  { %8 = vsyncpa [#allocation4], 0 }
   0x2   :  { %9 = vsyncpa [#allocation5], 0  ;;  %s187_s11 = scalar_lea.hbm %s357_s0, 16 }
   0x3   :  { %p188_p0 = scmp.ne.s32.totalorder %s357_s0, %s187_s11  ;;  %p191_p1 = scmp.lt.u32.totalorder %s187_s11, %s357_s0 }
   0x5   :  { %p193_p2 = pnand %p191_p1, %p188_p0 }
   0x7   :  { %196 = shalt.err (!%p193_p2)
}
   0x8   :  { %s247_s16 = smov [#allocation3]   ;;  %s248_s19 = smov [#allocation7]  }
   0x9   :  { %17 = dma.hbm_to_smem %s357_s0, 16, %s247_s16, [#allocation6]  }
   0xa   :  { %s24_s20 = sshll.u32 %s248_s19, 4  ;;  %s197_s23 = scalar_lea.hbm %s358_s1, 128  ;;  %s25_s20 = int_to_ptr.vmem [resolvable:$true] %s24_s20 }
   0xb   :  { %p198_p3 = scmp.ne.s32.totalorder %s358_s1, %s197_s23  ;;  %p201_p4 = scmp.lt.u32.totalorder %s197_s23, %s358_s1 }
   0xd   :  { %p203_p5 = pnand %p201_p4, %p198_p3 }
   0xf   :  { %206 = shalt.err (!%p203_p5)
}
  0x10   :  { %s207_s28 = scalar_lea.vmem %s25_s20, 128  ;;  %p212_p7 = scmp.lt.s32.totalorder %s25_s20, %s25_s20 }
  0x11   :  { %p208_p6 = scmp.ne.s32.totalorder %s25_s20, %s207_s28  ;;  %p213_p8 = scmp.lt.s32.totalorder %s207_s28, %s207_s28 }
  0x13   :  { %p214_p9 = por %p213_p8, %p212_p7 }
  0x15   :  { %p215_p10 = pnand %p214_p9, %p208_p6 }
  0x17   :  { %218 = shalt.err (!%p215_p10)
}
  0x18   :  { %27 = dma.hbm_to_vmem [thread:$0]  %s358_s1, 128, %s25_s20, [#allocation4]  }
  0x19   :  { %241 = dma.done.wait [#allocation6], 16  }
  0x1a   :  { %242 = vsyncadd [#allocation6], 4294967280 }
  0x1b   :  { %243 = dma.done.wait [#allocation4], 128  }
  0x1c   :  { %244 = vsyncadd [#allocation4], 4294967168 }
  0x1d   :  { %34 = sfence }
  0x1e   :  { %vm35_vm0 = vcmask 1048064   ;;  %v37_v0 = vld [vmem:[#allocation7] sm:$0xff]  ;;  %vm38_vm1 = vcmask 523264   ;;  %v249_v1 = vmov 0.0   ;;  %s250_s30 = smov 4   ;;  %s251_s3 = smov 2   ;;  %v101_v22 = vlaneseq }
  0x1f   :  { %36 = vst.msk [vmem:[#allocation2] sm:$0xff] %vm35_vm0, %v249_v1  ;;  %s252_s1 = smov 3   ;;  %s253_s4 = smov 1  }
  0x20   :  { %39 = vst.msk [vmem:[#allocation2] sm:$0xff] %vm38_vm1, %v37_v0  ;;  %s254_s5 = smov 127   ;;  %s255_s6 = smov 126   ;;  %v102_v30 = vand.u32 127, %v101_v22 }
  0x21   :  { %s256_s7 = smov 125   ;;  %s257_s8 = smov 124  }
  0x22   :  { %s308_s9 = sld [smem:[#allocation3]]  ;;  %s310_s10 = sld [smem:[#allocation3 + $0x1]]  ;;  %vm103_vm2 = vcmp.lt.s32.totalorder %v102_v30, 64 }
  0x23   :  { %s312_s11 = sld [smem:[#allocation3 + $0x2]]  ;;  %s314_s12 = sld [smem:[#allocation3 + $0x3]]  ;;  %v174_v38 = vsel %vm103_vm2, 1.0, %v249_v1 }
  0x24   :  { %s316_s13 = sld [smem:[#allocation3 + $0x4]]  ;;  %s318_s14 = sld [smem:[#allocation3 + $0x5]] }
  0x25   :  { %s322_s15 = sld [smem:[#allocation3 + $0x6]]  ;;  %s326_s16 = sld [smem:[#allocation3 + $0x7]] }
  0x26   :  { %s329_s17 = sld [smem:[#allocation3 + $0x8]]  ;;  %s258_s18 = smov [#allocation8]  }
  0x27   :  { %v40_v2 = vld [vmem:[#allocation2] sm:$0xff]  ;;  %s156_s19 = sshll.u32 %s258_s18, 4  ;;  %s157_s19 = int_to_ptr.vmem [resolvable:$true] %s156_s19 }
  0x28   :  { %43 = vrot.lane.b32.xlu0 %v40_v2, %s250_s30  ;;  %56 = vrot.lane.b32.xlu1 %v40_v2, %s251_s3  ;;  %v46_v5 = vstv %s308_s9  ;;  %v52_v6 = vstv %s310_s10  ;;  %s219_s20 = scalar_lea.vmem %s157_s19, 128  ;;  %p224_p12 = scmp.lt.s32.totalorder %s157_s19, %s157_s19 }
  0x29   :  { %v59_v7 = vstv %s312_s11  ;;  %v66_v9 = vstv %s314_s12  ;;  %p220_p11 = scmp.ne.s32.totalorder %s157_s19, %s219_s20  ;;  %p225_p13 = scmp.lt.s32.totalorder %s219_s20, %s219_s20 }
  0x2a   :  { %v70_v13 = vstv %s316_s13  ;;  %v77_v17 = vstv %s318_s14 }
  0x2b   :  { %v71_v21 = vmul.f32 %v70_v13, %v40_v2  ;;  %v84_v23 = vstv %s322_s15  ;;  %v91_v26 = vstv %s326_s16  ;;  %p226_p0 = por %p225_p13, %p224_p12 }
  0x2c   :  { %49 = vrot.lane.b32.xlu0 %v40_v2, %s252_s1  ;;  %63 = vrot.lane.b32.xlu1 %v40_v2, %s253_s4  ;;  %v98_v31 = vstv %s329_s17 }
  0x2d   :  { %p227_p1 = pnand %p226_p0, %p220_p11 }
  0x30   :  { %74 = vrot.lane.b32.xlu0 %v40_v2, %s254_s5  ;;  %81 = vrot.lane.b32.xlu1 %v40_v2, %s255_s6 }
  0x34   :  { %88 = vrot.lane.b32.xlu0 %v40_v2, %s256_s7  ;;  %95 = vrot.lane.b32.xlu1 %v40_v2, %s257_s8 }
  0x9a   :  { %v44_v3 = vpop.permute.xlu0 %43  ;;  %v57_v4 = vpop.permute.xlu1 %56 }
  0x9b   :  { %v47_v11 = vmul.f32 %v46_v5, %v44_v3  ;;  %v60_v14 = vmul.f32 %v59_v7, %v57_v4 }
  0x9e   :  { %v50_v8 = vpop.permute.xlu0 %49  ;;  %v64_v10 = vpop.permute.xlu1 %63 }
  0x9f   :  { %v53_v12 = vmul.f32 %v52_v6, %v50_v8  ;;  %v67_v16 = vmul.f32 %v66_v9, %v64_v10 }
  0xa1   :  { %v54_v15 = vadd.f32 %v53_v12, %v47_v11 }
  0xa2   :  { %v75_v18 = vpop.permute.xlu0 %74  ;;  %v82_v19 = vpop.permute.xlu1 %81 }
  0xa3   :  { %v61_v20 = vadd.f32 %v60_v14, %v54_v15  ;;  %v78_v25 = vmul.f32 %v77_v17, %v75_v18  ;;  %v85_v29 = vmul.f32 %v84_v23, %v82_v19 }
  0xa5   :  { %v68_v24 = vadd.f32 %v67_v16, %v61_v20 }
  0xa6   :  { %v89_v27 = vpop.permute.xlu0 %88  ;;  %v96_v32 = vpop.permute.xlu1 %95 }
  0xa7   :  { %v72_v28 = vadd.f32 %v71_v21, %v68_v24  ;;  %v92_v34 = vmul.f32 %v91_v26, %v89_v27  ;;  %v99_v36 = vmul.f32 %v98_v31, %v96_v32 }
  0xa9   :  { %v79_v33 = vadd.f32 %v78_v25, %v72_v28 }
  0xab   :  { %v86_v35 = vadd.f32 %v85_v29, %v79_v33 }
  0xad   :  { %v93_v37 = vadd.f32 %v92_v34, %v86_v35 }
  0xaf   :  { %v100_v39 = vadd.f32 %v99_v36, %v93_v37 }
  0xb1   :  { %v106_v40 = vmul.f32 %v174_v38, %v100_v39 }
  0xb3   :  { %112 = vrot.lane.b32.xlu1 %v106_v40, %s256_s7  ;;  %108 = vrot.lane.b32.xlu0 %v106_v40, %s257_s8  ;;  %v127_v54 = vmul.f32 %v106_v40, %v70_v13 }
  0xb7   :  { %122 = vrot.lane.b32.xlu1 %v106_v40, %s254_s5  ;;  %117 = vrot.lane.b32.xlu0 %v106_v40, %s255_s6 }
  0xbb   :  { %134 = vrot.lane.b32.xlu1 %v106_v40, %s251_s3  ;;  %129 = vrot.lane.b32.xlu0 %v106_v40, %s253_s4 }
  0xbf   :  { %144 = vrot.lane.b32.xlu1 %v106_v40, %s250_s30  ;;  %139 = vrot.lane.b32.xlu0 %v106_v40, %s252_s1 }
 0x125   :  { %v113_v41 = vpop.permute.xlu1 %112  ;;  %v109_v42 = vpop.permute.xlu0 %108 }
 0x126   :  { %v115_v43 = vmul.f32 %v113_v41, %v52_v6  ;;  %v111_v44 = vmul.f32 %v109_v42, %v46_v5 }
 0x128   :  { %v116_v47 = vadd.f32 %v115_v43, %v111_v44 }
 0x129   :  { %v123_v45 = vpop.permute.xlu1 %122  ;;  %v118_v46 = vpop.permute.xlu0 %117 }
 0x12a   :  { %v120_v48 = vmul.f32 %v118_v46, %v59_v7  ;;  %v125_v49 = vmul.f32 %v123_v45, %v66_v9 }
 0x12c   :  { %v121_v50 = vadd.f32 %v120_v48, %v116_v47 }
 0x12d   :  { %v135_v51 = vpop.permute.xlu1 %134  ;;  %v130_v52 = vpop.permute.xlu0 %129 }
 0x12e   :  { %v126_v53 = vadd.f32 %v125_v49, %v121_v50  ;;  %v132_v56 = vmul.f32 %v130_v52, %v77_v17  ;;  %v137_v58 = vmul.f32 %v135_v51, %v84_v23 }
 0x130   :  { %v128_v55 = vadd.f32 %v127_v54, %v126_v53 }
 0x131   :  { %v140_v57 = vpop.permute.xlu0 %139  ;;  %v145_v60 = vpop.permute.xlu1 %144 }
 0x132   :  { %v133_v59 = vadd.f32 %v132_v56, %v128_v55  ;;  %v142_v62 = vmul.f32 %v140_v57, %v91_v26  ;;  %v147_v63 = vmul.f32 %v145_v60, %v98_v31 }
 0x134   :  { %v138_v61 = vadd.f32 %v137_v58, %v133_v59 }
 0x136   :  { %v143_v0 = vadd.f32 %v142_v62, %v138_v61 }
 0x138   :  { %v148_v1 = vadd.f32 %v147_v63, %v143_v0 }
 0x13a   :  { %149 = vst.msk [vmem:[#allocation8] sm:$0xff] %vm38_vm1, %v148_v1 }
 0x13b   :  { %230 = shalt.err (!%p227_p1)
}
 0x13c   :  { %s231_s23 = scalar_lea.hbm %s359_s2, 128 }
 0x13d   :  { %p232_p2 = scmp.ne.s32.totalorder %s359_s2, %s231_s23  ;;  %p235_p3 = scmp.lt.u32.totalorder %s231_s23, %s359_s2 }
 0x13f   :  { %p237_p4 = pnand %p235_p3, %p232_p2 }
 0x141   :  { %240 = shalt.err (!%p237_p4)
}
 0x142   :  { %159 = dma.vmem_to_hbm [thread:$0]  %s157_s19, 128, %s359_s2, [#allocation5]  }
 0x143   :  { %245 = dma.done.wait [#allocation5], 128  }
 0x144   :  { %246 = vsyncadd [#allocation5], 4294967168 }
 0x145   :  { %163 = vsyncpa [#allocation4], 1 }
 0x146   :  { %164 = vsyncpa [#allocation5], 1 }
 0x147   :  { %165 = vsyncpa [#allocation6], 1 }

</bundles_post_ra>
